<compile_context>
chip_gen: v5e
topology: v5e:2x2
jax: 0.10.0
libtpu: 0.0.40
codegen_flags: <defaults>
</compile_context>

<pallas_src>
import jax
import jax.numpy as jnp
from jax import lax
from jax.experimental import pallas as pl
from jax.experimental.pallas import tpu as pltpu


def _round_up(a, m):
    return (a + m - 1) // m * m


def _l2_normalize(v, eps):
    # matches torch.nn.functional.normalize(v, dim=0, eps=eps)
    return v / jnp.maximum(jnp.sqrt(jnp.sum(v * v)), eps)


def sn_convt_gemm_kernel(sigma_ref, x_ref, w_ref, b_ref, o_ref, acc_ref):
    # sigma_ref: (1,) f32 in SMEM
    # x_ref: (tm, tk) im2col patches; w_ref: (tk, tn) weight (K, N) layout (no .T needed)
    # b_ref: (1, tn) bias; o_ref: (tm, tn); acc_ref: (tm, tn) f32 scratch accumulator
    k = pl.program_id(2)

    @pl.when(k == 0)
    def _():
        acc_ref[...] = jnp.zeros_like(acc_ref)

    acc_ref[...] += jnp.dot(x_ref[...], w_ref[...],
                            preferred_element_type=jnp.float32)

    @pl.when(k == pl.num_programs(2) - 1)
    def _():
        inv_sigma = 1.0 / sigma_ref[0]
        o_ref[...] = (acc_ref[...] * inv_sigma + b_ref[...]).astype(o_ref.dtype)


def sn_conv_transpose2d_forward(x, w, b, u, *, stride=(1, 1), padding=(0, 0),
                                output_padding=(0, 0), dilation=(1, 1), eps=1e-12):
    """Forward of SN_ConvTranspose2d.

    x: (B, C_in, H, W); w: (C_in, C_out, kH, kW) (torch ConvTranspose2d layout);
    b: (C_out,); u: (C_out,) power-iteration vector.
    Returns (y, u_new) with y of shape (B, C_out, H_out, W_out).
    """
    B, C_in, H, W = x.shape
    C_in_w, C_out, kH, kW = w.shape
    assert C_in == C_in_w
    sH, sW = stride
    pH, pW = padding
    opH, opW = output_padding
    dH, dW = dilation

    # ---------- spectral norm: one power-iteration step (tiny, plain JAX) ----------
    w_mat = jnp.transpose(w, (1, 0, 2, 3)).reshape(C_out, C_in * kH * kW)
    v = _l2_normalize(w_mat.T @ u, eps)
    wv = w_mat @ v                      # computed once, reused for u_new AND sigma
    u_new = _l2_normalize(wv, eps)
    sigma = jnp.dot(u_new, wv).astype(jnp.float32)
    sigma_arr = jnp.reshape(sigma, (1,))

    # ---------- conv_transpose -> stride-1 conv over zero-dilated, padded input ----------
    H_out = (H - 1) * sH - 2 * pH + dH * (kH - 1) + opH + 1
    W_out = (W - 1) * sW - 2 * pW + dW * (kW - 1) + opW + 1
    pad_cfg = ((0, 0, 0), (0, 0, 0),
               (dH * (kH - 1) - pH, dH * (kH - 1) - pH + opH, sH - 1),
               (dW * (kW - 1) - pW, dW * (kW - 1) - pW + opW, sW - 1))
    x_pad = lax.pad(x, jnp.array(0.0, x.dtype), pad_cfg)

    # im2col: (B, H_out, W_out, C_in*kH*kW) with K index = ci*(kH*kW) + kh*kW + kw
    cols = []
    for kh in range(kH):
        for kw in range(kW):
            cols.append(lax.slice(
                x_pad, (0, 0, kh * dH, kw * dW),
                (B, C_in, kh * dH + H_out, kw * dW + W_out)))
    patches = jnp.stack(cols, axis=2)                  # (B, C_in, kH*kW, H_out, W_out)
    patches = jnp.transpose(patches, (0, 3, 4, 1, 2))  # (B, H_out, W_out, C_in, kH*kW)

    Mdim = B * H_out * W_out
    Kdim = C_in * kH * kW
    Ndim = C_out
    x_col = patches.reshape(Mdim, Kdim)

    # weight as (K, N) matrix of the spatially flipped kernel -> no transpose in-kernel
    w_flip = w[:, :, ::-1, ::-1]                                  # (C_in, C_out, kH, kW)
    w_gemm = jnp.transpose(w_flip, (0, 2, 3, 1)).reshape(Kdim, Ndim)

    # ---------- pad to lane/tile multiples so MXU tiles + output stores are full-width ----------
    tn = 128
    tk = min(512, _round_up(Kdim, 128))
    tm = min(256, _round_up(Mdim, 128))
    M_pad = _round_up(Mdim, tm)
    K_pad = _round_up(Kdim, tk)
    N_pad = _round_up(Ndim, tn)

    x_col_p = jnp.pad(x_col.astype(jnp.float32), ((0, M_pad - Mdim), (0, K_pad - Kdim)))
    w_p = jnp.pad(w_gemm.astype(jnp.float32), ((0, K_pad - Kdim), (0, N_pad - Ndim)))
    b_p = jnp.pad(b.astype(jnp.float32).reshape(1, Ndim), ((0, 0), (0, N_pad - Ndim)))

    grid = (M_pad // tm, N_pad // tn, K_pad // tk)

    y_mat = pl.pallas_call(
        sn_convt_gemm_kernel,
        out_shape=jax.ShapeDtypeStruct((M_pad, N_pad), x.dtype),
        grid=grid,
        in_specs=[
            pl.BlockSpec(memory_space=pltpu.MemorySpace.SMEM),    # sigma scalar
            pl.BlockSpec((tm, tk), lambda i, j, k: (i, k)),       # im2col patches
            pl.BlockSpec((tk, tn), lambda i, j, k: (k, j)),       # weight (K, N)
            pl.BlockSpec((1, tn), lambda i, j, k: (0, j)),        # bias
        ],
        out_specs=pl.BlockSpec((tm, tn), lambda i, j, k: (i, j)),
        scratch_shapes=[pltpu.VMEM((tm, tn), jnp.float32)],
        compiler_params=pltpu.CompilerParams(
            dimension_semantics=("parallel", "parallel", "arbitrary")),
        cost_estimate=pl.CostEstimate(
            flops=2 * Mdim * Kdim * Ndim,
            transcendentals=0,
            bytes_accessed=4 * (Mdim * Kdim + Kdim * Ndim + Mdim * Ndim + Ndim)),
    )(sigma_arr, x_col_p, w_p, b_p)

    y = y_mat[:Mdim, :Ndim].reshape(B, H_out, W_out, C_out)
    y = jnp.transpose(y, (0, 3, 1, 2))
    return y, u_new


# ---------------- pure-JAX reference (independent scatter-add formulation) ----------------
def conv_transpose2d_ref(x, w, b, stride, padding, output_padding, dilation):
    B, C_in, H, W = x.shape
    _, C_out, kH, kW = w.shape
    sH, sW = stride
    pH, pW = padding
    opH, opW = output_padding
    dH, dW = dilation
    H_out = (H - 1) * sH - 2 * pH + dH * (kH - 1) + opH + 1
    W_out = (W - 1) * sW - 2 * pW + dW * (kW - 1) + opW + 1
    H_full = (H - 1) * sH + dH * (kH - 1) + 1 + opH
    W_full = (W - 1) * sW + dW * (kW - 1) + 1 + opW
    y = jnp.zeros((B, C_out, H_full, W_full), jnp.float32)
    for kh in range(kH):
        for kw in range(kW):
            contrib = jnp.einsum('nchw,cd->ndhw', x, w[:, :, kh, kw],
                                 precision=lax.Precision.HIGHEST)
            y = y.at[:, :,
                     kh * dH: kh * dH + (H - 1) * sH + 1: sH,
                     kw * dW: kw * dW + (W - 1) * sW + 1: sW].add(contrib)
    y = y[:, :, pH: pH + H_out, pW: pW + W_out]
    return y + b.reshape(1, C_out, 1, 1)


if __name__ == "__main__":
    # Shapes consistent with nn.ConvTranspose2d(in_channels=4, out_channels=8,
    #                                           kernel_size=4, stride=2, padding=1)
    B, C_in, H, W = 2, 4, 8, 8
    C_out, kH, kW = 8, 4, 4
    stride, padding, output_padding, dilation = (2, 2), (1, 1), (0, 0), (1, 1)
    eps = 1e-12

    key = jax.random.PRNGKey(0)
    kx, kw_, kb, ku = jax.random.split(key, 4)

    x = jax.random.normal(kx, (B, C_in, H, W), dtype=jnp.float32)
    # torch ConvTranspose2d weight layout: (C_in, C_out, kH, kW)
    w = jax.random.normal(kw_, (C_in, C_out, kH, kW), dtype=jnp.float32) * 0.1
    b = jax.random.normal(kb, (C_out,), dtype=jnp.float32) * 0.01
    u = _l2_normalize(jax.random.normal(ku, (C_out,), dtype=jnp.float32), eps)

    y, u_new = sn_conv_transpose2d_forward(
        x, w, b, u, stride=stride, padding=padding,
        output_padding=output_padding, dilation=dilation, eps=eps)
    y = jax.block_until_ready(y)

    # reference: spectral-norm the weight the same way torch does (dim=1), then conv_transpose
    w_mat = jnp.transpose(w, (1, 0, 2, 3)).reshape(C_out, -1)
    v_r = _l2_normalize(w_mat.T @ u, eps)
    u_r = _l2_normalize(w_mat @ v_r, eps)
    sigma_r = jnp.dot(u_r, w_mat @ v_r)
    y_ref = conv_transpose2d_ref(x, w / sigma_r, b, stride, padding,
                                 output_padding, dilation)

    H_out = (H - 1) * stride[0] - 2 * padding[0] + dilation[0] * (kH - 1) + output_padding[0] + 1
    W_out = (W - 1) * stride[1] - 2 * padding[1] + dilation[1] * (kW - 1) + output_padding[1] + 1
    assert y.shape == (B, C_out, H_out, W_out)
    assert jnp.allclose(y, y_ref, atol=1e-3, rtol=1e-3), "mismatch vs reference"
    print("KERNEL_OK")
</pallas_src>

<mosaic_0001>
module attributes {stable_mosaic.version = 11 : i64} {
  func.func @sn_convt_gemm_kernel(%arg0: i32, %arg1: i32, %arg2: i32, %arg3: memref<1xf32, #tpu.memory_space<smem>>, %arg4: memref<256x128xf32, #tpu.memory_space<vmem>>, %arg5: memref<128x128xf32, #tpu.memory_space<vmem>>, %arg6: memref<1x128xf32, #tpu.memory_space<vmem>>, %arg7: memref<256x128xf32, #tpu.memory_space<vmem>>, %arg8: memref<256x128xf32, #tpu.memory_space<vmem>>) attributes {dimension_semantics = [#tpu.dimension_semantics<parallel>, #tpu.dimension_semantics<parallel>, #tpu.dimension_semantics<arbitrary>], iteration_bounds = array<i64: 2, 1, 1>, scalar_prefetch = 0 : i64, scratch_operands = 1 : i64, tpu.core_type = #tpu.core_type<tc>, window_params = [{transform_indices = @transform_0, window_bounds = array<i64: 1>}, {transform_indices = @transform_1, window_bounds = array<i64: 256, 128>}, {transform_indices = @transform_2, window_bounds = array<i64: 128, 128>}, {transform_indices = @transform_3, window_bounds = array<i64: 1, 128>}, {transform_indices = @transform_4, window_bounds = array<i64: 256, 128>}]} {
    %c0_i32 = arith.constant 0 : i32
    %0 = arith.cmpi eq, %arg2, %c0_i32 : i32
    %1 = arith.extui %0 : i1 to i32
    %c0_i32_0 = arith.constant 0 : i32
    %2 = arith.cmpi ne, %1, %c0_i32_0 : i32
    scf.if %2 {
      %cst_10 = arith.constant 0.000000e+00 : f32
      %12 = vector.broadcast %cst_10 : f32 to vector<256x128xf32>
      %c0_11 = arith.constant 0 : index
      %c0_12 = arith.constant 0 : index
      %13 = vector.load %arg8[%c0_11, %c0_12] : memref<256x128xf32, #tpu.memory_space<vmem>>, vector<256x128xf32>
      tpu.vector_store %arg8[%c0_11, %c0_12], %12 {strides = array<i32>} : memref<256x128xf32, #tpu.memory_space<vmem>>, vector<256x128xf32>,
    } else {
    }
    %c0 = arith.constant 0 : index
    %c0_1 = arith.constant 0 : index
    %3 = vector.load %arg8[%c0, %c0_1] : memref<256x128xf32, #tpu.memory_space<vmem>>, vector<256x128xf32>
    %c0_2 = arith.constant 0 : index
    %c0_3 = arith.constant 0 : index
    %4 = vector.load %arg4[%c0_2, %c0_3] : memref<256x128xf32, #tpu.memory_space<vmem>>, vector<256x128xf32>
    %c0_4 = arith.constant 0 : index
    %c0_5 = arith.constant 0 : index
    %5 = vector.load %arg5[%c0_4, %c0_5] : memref<128x128xf32, #tpu.memory_space<vmem>>, vector<128x128xf32>
    %cst = arith.constant dense<0.000000e+00> : vector<256x128xf32>
    %6 = tpu.matmul %4, %5, %cst {dimension_numbers = #tpu.dot_dimension_numbers<[1], [0], [0], [1], [0, 0, 1, 1], [], []>} : vector<256x128xf32>, vector<128x128xf32>, vector<256x128xf32> -> vector<256x128xf32>
    %7 = arith.addf %3, %6 : vector<256x128xf32>
    %c0_6 = arith.constant 0 : index
    %c0_7 = arith.constant 0 : index
    %8 = vector.load %arg8[%c0_6, %c0_7] : memref<256x128xf32, #tpu.memory_space<vmem>>, vector<256x128xf32>
    tpu.vector_store %arg8[%c0_6, %c0_7], %7 {strides = array<i32>} : memref<256x128xf32, #tpu.memory_space<vmem>>, vector<256x128xf32>,
    %c0_i32_8 = arith.constant 0 : i32
    %9 = arith.cmpi eq, %arg2, %c0_i32_8 : i32
    %10 = arith.extui %9 : i1 to i32
    %c0_i32_9 = arith.constant 0 : i32
    %11 = arith.cmpi ne, %10, %c0_i32_9 : i32
    scf.if %11 {
      %c0_10 = arith.constant 0 : index
      %12 = memref.load %arg3[%c0_10] : memref<1xf32, #tpu.memory_space<smem>>
      %cst_11 = arith.constant 1.000000e+00 : f32
      %13 = arith.divf %cst_11, %12 : f32
      %c0_12 = arith.constant 0 : index
      %c0_13 = arith.constant 0 : index
      %14 = vector.load %arg8[%c0_12, %c0_13] : memref<256x128xf32, #tpu.memory_space<vmem>>, vector<256x128xf32>
      %15 = vector.broadcast %13 : f32 to vector<256x128xf32>
      %16 = arith.mulf %14, %15 : vector<256x128xf32>
      %c0_14 = arith.constant 0 : index
      %c0_15 = arith.constant 0 : index
      %17 = vector.load %arg6[%c0_14, %c0_15] : memref<1x128xf32, #tpu.memory_space<vmem>>, vector<1x128xf32>
      %18 = vector.broadcast %17 : vector<1x128xf32> to vector<256x128xf32>
      %19 = arith.addf %16, %18 : vector<256x128xf32>
      %c0_16 = arith.constant 0 : index
      %c0_17 = arith.constant 0 : index
      %20 = vector.load %arg7[%c0_16, %c0_17] : memref<256x128xf32, #tpu.memory_space<vmem>>, vector<256x128xf32>
      tpu.vector_store %arg7[%c0_16, %c0_17], %19 {strides = array<i32>} : memref<256x128xf32, #tpu.memory_space<vmem>>, vector<256x128xf32>,
    } else {
    }
    return
  }
  func.func @transform_0(%arg0: i32, %arg1: i32, %arg2: i32) -> i32 {
    %c0_i32 = arith.constant 0 : i32
    %c0_i32_0 = arith.constant 0 : i32
    return %c0_i32 : i32
  }
  func.func @transform_1(%arg0: i32, %arg1: i32, %arg2: i32) -> (i32, i32) {
    %c0_i32 = arith.constant 0 : i32
    return %arg0, %arg2 : i32, i32
  }
  func.func @transform_2(%arg0: i32, %arg1: i32, %arg2: i32) -> (i32, i32) {
    %c0_i32 = arith.constant 0 : i32
    return %arg2, %arg1 : i32, i32
  }
  func.func @transform_3(%arg0: i32, %arg1: i32, %arg2: i32) -> (i32, i32) {
    %c0_i32 = arith.constant 0 : i32
    %c0_i32_0 = arith.constant 0 : i32
    return %c0_i32, %arg1 : i32, i32
  }
  func.func @transform_4(%arg0: i32, %arg1: i32, %arg2: i32) -> (i32, i32) {
    %c0_i32 = arith.constant 0 : i32
    return %arg0, %arg1 : i32, i32
  }
}

</mosaic_0001>

<bundles_post_ra>
// kernel: tpu_custom_call.1
= control target key start
LH: loop header
LB: loop body
LE: loop exit
PB: predicated region body
PF: predicated region fallthrough
CT: control target
= control target key end

     0   :  { %s1495_s0 = inlined_call_operand.<no memory space> [shape: f32[1], index: 0, kind: input, shape index: {}]   ;;  %s1496_s1 = inlined_call_operand.hbm [shape: f32[512,128], index: 1, kind: input, shape index: {}]   ;;  %s1497_s2 = inlined_call_operand.hbm [shape: f32[128,128], index: 2, kind: input, shape index: {}]   ;;  %s1498_s3 = inlined_call_operand.vmem [shape: f32[1,128], index: 3, kind: input, shape index: {}]   ;;  %s1499_s4 = inlined_call_operand.hbm [shape: f32[512,128], index: 4, kind: output, shape index: {}]  }
   0x1   :  { %1501 = sst [smem:[#allocation13_spill]] %s1497_s2 }
   0x2   :  { %9 = sst [smem:[#allocation3]] %s1495_s0 }
   0x3   :  { %10 = vsyncpa [#allocation5], 0 }
   0x4   :  { %12 = vsyncpa [#allocation5 + $0x1], 0 }
   0x5   :  { %13 = vsyncpa [#allocation8], 0 }
   0x6   :  { %14 = vsyncpa [#allocation6], 0 }
   0x7   :  { %16 = vsyncpa [#allocation6 + $0x1], 0  ;;  %s1196_s17 = smov 0   ;;  %s1198_s18 = smov 0  }
   0x8   :  { %s1200_s19 = smov 0   ;;  %s1202_s20 = smov 0  }
   0x9   :  { %s1204_s21 = smov 0   ;;  %s1206_s22 = smov 0  }
   0xa LB: > { %s865_s0 = sadd.s32 4294967295, %s1161_s22   ;;  %s866_s23 = sadd.s32 4294967294, %s1161_s22   ;;  %s1161_s22 = sphi %s1206_s22, %s22_s22   ;;  %s1157_s21 = sphi %s1204_s21, %s1515_s21   ;;  %s1153_s20 = sphi %s1202_s20, %s1514_s20   ;;  %s1149_s19 = sphi %s1200_s19, %s1513_s19   ;;  %s1145_s18 = sphi %s1198_s18, %s1512_s18   ;;  %s1141_s17 = sphi %s1196_s17, %s1511_s17  }
   0xb   : > { %p84_p0 = scmp.ne.s32.totalorder %s1145_s18, %s1141_s17  ;;  %p1230_p1 = scmp.eq.s32.totalorder %s865_s0, 0 }
   0xc   : > { %p1234_p2 = scmp.eq.s32.totalorder %s865_s0, 1  ;;  %p170_p3 = scmp.eq.s32.totalorder %s866_s23, 1 }
   0xd   : > { %p1240_p4 = por %p1230_p1, %p84_p0  ;;  %p867_p5 = scmp.ge.s32.totalorder %s1161_s22, 1 }
   0xe   : > { %p1245_p6 = por %p170_p3, %p84_p0  ;;  %p177_p7 = scmp.lt.s32.totalorder %s1161_s22, 3 }
   0xf   : > { %s1506_s2 = sld [smem:[#allocation13_spill]]  ;;  %s1163_s6 = smov [#allocation7]  }
  0x10   : > { %p1253_p8 = pnand %p867_p5, %p177_p7  ;;  %s197_s7 = sshll.u32 %s1163_s6, 4  ;;  %s198_s7 = int_to_ptr.vmem [resolvable:$true] %s197_s7 }
  0x11   : > { %p870_p11 = scmp.ge.s32.totalorder %s1161_s22, 2  ;;  %s1500_s8 = smov 128  }
  0x12   : > { %p943_p9 = pneg %p1253_p8  ;;  %s1165_s9 = smov 8  }
  0x13   : > { %s41_s10 = sadd.s32 1, %s1157_s21  ;;  %s71_s11 = sadd.s32 1, %s1149_s19 }
  0x14   : > { %p944_p10 = pnand %p943_p9, %p1230_p1  ;;  %p43_p12 = scmp.ge.s32.totalorder %s41_s10, 2 }
  0x15   : > { %s195_s30 = sshll.u32 %s1506_s2, 4  ;;  %p78_p13 = scmp.ne.s32.totalorder %s1149_s19, %s1145_s18  ;;  %s196_s30 = int_to_ptr.hbm [resolvable:$true] %s195_s30 }
  0x16   : > { %946 = dma.hbm_to_vmem [thread:$0]  (!%p944_p10), %s196_s30, 2048, %s198_s7, [#allocation8], %s1500_s8, %s1500_s8, %s1165_s9  }
  0x17   : > { %p79_p0 = scmp.eq.s32.totalorder %s1161_s22, 0  ;;  %s1517_s10 = smov (%p43_p12, %s41_s10), 0 }
  0x18   : > { %p1278_p5 = por %p1234_p2, %p78_p13  ;;  %s66_s14 = ssub.s32 %s1157_s21, %s1517_s10 }
  0x19   : > { %p1272_p3 = por %p79_p0, %p78_p13  ;;  %p956_p7 = scmp.lt.s32.totalorder %s1161_s22, 2 }
  0x1a   : > { %p69_p9 = scmp.eq.s32.totalorder %s66_s14, 0  ;;  %s217_s15 = sand.u32 1, %s1149_s19  }
  0x1b   : > { %s871_s16 = sshll.u32 %s217_s15, 8  ;;  %s883_s23 = sshll.u32 %s1157_s21, 8 }
  0x1c   : > { %s1287_s0 = scalar_select %p69_p9, %s1149_s19, %s71_s11  }
  0x1d   : > { %s227_s30 = scalar_lea.hbm %s1496_s1, %s883_s23  ;;  %s221_s6 = scalar_lea.vmem [#allocation4], %s871_s16 }
  0x1e   : > { %s230_s7 = sshll.u32 %s221_s6, 4  ;;  %s228_s25 = sshll.u32 %s227_s30, 4  ;;  %s231_s7 = int_to_ptr.vmem [resolvable:$true] %s230_s7  ;;  %s229_s25 = int_to_ptr.hbm [resolvable:$true] %s228_s25 }
  0x1f   : > { %p948_p2 = pnand %p956_p7, %p1272_p3  ;;  %s218_s8 = scalar_lea.sflag [#allocation5], %s217_s15 }
  0x20   : > { %s1510_s2 = smov 128   ;;  %242 = sbr.rel (%p1253_p8) target bundleno = 269 (0x10d), region = 36 }
  0x21   : > { %950 = dma.hbm_to_vmem [thread:$0]  (!%p948_p2), %s229_s25, 4096, %s231_s7, %s218_s8, %s1510_s2, %s1510_s2, %s1165_s9  }
  0x22   : > { %s1301_s11 = sand.u32 (!%p1253_p8), 1, %s1145_s18  }
  0x23   : > { %s875_s14 = sshll.u32 (!%p1253_p8), %s1301_s11, 8  ;;  %s245_s16 = scalar_lea.sflag (!%p1253_p8), [#allocation5], %s1301_s11 }
  0x24   : > { %s1307_s12 = scalar_lea.vmem (!%p1253_p8), [#allocation4], %s875_s14 }
  0x25   : > { %1128 = dma.done.wait (%p1240_p4), %s245_s16, 4096  }
  0x26   : > { %1130 = vsyncadd (%p1240_p4), %s245_s16, 4294963200 }
  0x27   : > { %1132 = dma.done.wait (%p1230_p1), [#allocation8], 2048  }
  0x28   : > { %1134 = vsyncadd (%p1230_p1), [#allocation8], 4294965248  ;;  %v403_v0 = vld [vmem:[#allocation7 + $0x78] sm:$0xff]  ;;  %v402_v1 = vld [vmem:[#allocation7 + $0x70] sm:$0xff]  ;;  %s584_s2 = sld [smem:[#allocation3]]  ;;  %s1362_s8 = scalar_lea.vmem [#allocation9], %s875_s14 }
  0x29   : > { %886 = vmatpush.msra.mxu2 %v403_v0  ;;  %887 = vmatpush.msra.mxu3 %v403_v0  ;;  %v401_v2 = vld [vmem:[#allocation7 + $0x68] sm:$0xff]  ;;  %v400_v3 = vld [vmem:[#allocation7 + $0x60] sm:$0xff]  ;;  %v399_v4 = vld [vmem:[#allocation7 + $0x58] sm:$0xff]  ;;  %s884_s9 = sshll.u32 %s1153_s20, 8  ;;  %s748_s20 = sshll.u32 %s1362_s8, 4  ;;  %s749_s20 = int_to_ptr.vmem [resolvable:$true] %s748_s20 }
  0x2a   : > { %404 = vmatpush.msra.mxu0 %v403_v0  ;;  %885 = vmatpush.msra.mxu1 %v403_v0  ;;  %v398_v5 = vld [vmem:[#allocation7 + $0x50] sm:$0xff]  ;;  %v397_v6 = vld [vmem:[#allocation7 + $0x48] sm:$0xff]  ;;  %v396_v7 = vld [vmem:[#allocation7 + $0x40] sm:$0xff]  ;;  %s747_s28 = scalar_lea.hbm %s1499_s4, %s884_s9  ;;  %s735_s30 = scalar_lea.sflag [#allocation6], %s1301_s11 }
  0x2b   : > { %889 = vmatpush.msra.mxu2 %v402_v1  ;;  %890 = vmatpush.msra.mxu3 %v402_v1  ;;  %v395_v8 = vld [vmem:[#allocation7 + $0x38] sm:$0xff]  ;;  %v394_v9 = vld [vmem:[#allocation7 + $0x30] sm:$0xff]  ;;  %v393_v10 = vld [vmem:[#allocation7 + $0x28] sm:$0xff]  ;;  %s750_s29 = sshll.u32 %s747_s28, 4  ;;  %s1095_s16 = scalar_lea.hbm %s1499_s4, 512  ;;  %s751_s29 = int_to_ptr.hbm [resolvable:$true] %s750_s29 }
  0x2c   : > { %405 = vmatpush.msra.mxu0 %v402_v1  ;;  %888 = vmatpush.msra.mxu1 %v402_v1  ;;  %v392_v11 = vld [vmem:[#allocation7 + $0x20] sm:$0xff]  ;;  %v391_v12 = vld [vmem:[#allocation7 + $0x18] sm:$0xff]  ;;  %v390_v13 = vld [vmem:[#allocation7 + $0x10] sm:$0xff]  ;;  %s1089_s6 = sshra.s32 %s751_s29, 4  ;;  %s1090_s6 = int_to_ptr.hbm [resolvable:$true] %s1089_s6 }
  0x2d   : > { %892 = vmatpush.msra.mxu2 %v401_v2  ;;  %893 = vmatpush.msra.mxu3 %v401_v2  ;;  %v389_v14 = vld [vmem:[#allocation7 + $0x8] sm:$0xff]  ;;  %v388_v15 = vld [vmem:[#allocation7] sm:$0xff]  ;;  %v374_v24 = vld [vmem:[%s1307_s12 + $0x90] sm:$0xff]  ;;  %s1091_s7 = scalar_lea.hbm %s1090_s6, 256  ;;  %p1096_p10 = scmp.lt.s32.totalorder %s1090_s6, %s1499_s4 }
  0x2e   : > { %406 = vmatpush.msra.mxu0 %v401_v2  ;;  %891 = vmatpush.msra.mxu1 %v401_v2  ;;  %v372_v16 = vld [vmem:[%s1307_s12 + $0x80] sm:$0xff]  ;;  %v373_v20 = vld [vmem:[%s1307_s12 + $0x88] sm:$0xff]  ;;  %v382_v25 = vld [vmem:[%s1307_s12 + $0xd0] sm:$0xff]  ;;  %v585_v32 = vstv %s584_s2  ;;  %p1092_p1 = scmp.ne.s32.totalorder %s1090_s6, %s1091_s7  ;;  %p1097_p12 = scmp.lt.s32.totalorder %s1095_s16, %s1091_s7 }
  0x2f   : > { %895 = vmatpush.msra.mxu2 %v400_v3  ;;  %896 = vmatpush.msra.mxu3 %v400_v3  ;;  %v380_v17 = vld [vmem:[%s1307_s12 + $0xc0] sm:$0xff]  ;;  %v381_v21 = vld [vmem:[%s1307_s12 + $0xc8] sm:$0xff]  ;;  %v358_v26 = vld [vmem:[%s1307_s12 + $0x10] sm:$0xff]  ;;  %1013 = vrcp.f32 %v585_v32  ;;  %v597_v39 = vand.u32 2147483648, %v585_v32  ;;  %vm591_vm0 = vweird.f32 %v585_v32  ;;  %v595_v41 = vand.u32 2147483647, %v585_v32 }
  0x30   : > { %407 = vmatpush.msra.mxu0 %v400_v3  ;;  %894 = vmatpush.msra.mxu1 %v400_v3  ;;  %v356_v18 = vld [vmem:[%s1307_s12] sm:$0xff]  ;;  %v357_v22 = vld [vmem:[%s1307_s12 + $0x8] sm:$0xff]  ;;  %v366_v27 = vld [vmem:[%s1307_s12 + $0x50] sm:$0xff]  ;;  %p1093_p4 = pnand %p1092_p1, %p1278_p5  ;;  %p1098_p13 = por %p1097_p12, %p1096_p10 }
  0x31   : > { %898 = vmatpush.msra.mxu2 %v399_v4  ;;  %899 = vmatpush.msra.mxu3 %v399_v4  ;;  %v364_v19 = vld [vmem:[%s1307_s12 + $0x40] sm:$0xff]  ;;  %v365_v23 = vld [vmem:[%s1307_s12 + $0x48] sm:$0xff]  ;;  %v375_v28 = vld [vmem:[%s1307_s12 + $0x98] sm:$0xff]  ;;  %v598_v47 = vor.u32 1.1754944e-38, %v597_v39  ;;  %vm596_vm3 = vcmp.eq.f32.partialorder %v595_v41, 8.507059e+37 }
  0x32   : > { %408 = vmatpush.msra.mxu0 %v399_v4  ;;  %897 = vmatpush.msra.mxu1 %v399_v4  ;;  %v383_v29 = vld [vmem:[%s1307_s12 + $0xd8] sm:$0xff]  ;;  %v376_v33 = vld [vmem:[%s1307_s12 + $0xa0] sm:$0xff]  ;;  %v377_v42 = vld [vmem:[%s1307_s12 + $0xa8] sm:$0xff]  ;;  %p1094_p8 = pneg %p1093_p4 }
  0x33   : > { %901 = vmatpush.msra.mxu2 %v398_v5  ;;  %902 = vmatpush.msra.mxu3 %v398_v5  ;;  %v359_v30 = vld [vmem:[%s1307_s12 + $0x18] sm:$0xff]  ;;  %v384_v34 = vld [vmem:[%s1307_s12 + $0xe0] sm:$0xff]  ;;  %v385_v43 = vld [vmem:[%s1307_s12 + $0xe8] sm:$0xff] }
  0x34   : > { %409 = vmatpush.msra.mxu0 %v398_v5  ;;  %900 = vmatpush.msra.mxu1 %v398_v5  ;;  %v367_v31 = vld [vmem:[%s1307_s12 + $0x58] sm:$0xff]  ;;  %v360_v35 = vld [vmem:[%s1307_s12 + $0x20] sm:$0xff]  ;;  %v361_v45 = vld [vmem:[%s1307_s12 + $0x28] sm:$0xff]  ;;  %p1099_p0 = pnand %p1098_p13, %p1094_p8 }
  0x35   : > { %904 = vmatpush.msra.mxu2 %v397_v6  ;;  %905 = vmatpush.msra.mxu3 %v397_v6  ;;  %v368_v36 = vld [vmem:[%s1307_s12 + $0x60] sm:$0xff]  ;;  %v1014_v37 = vpop.eup %1013  ;;  %v369_v46 = vld [vmem:[%s1307_s12 + $0x68] sm:$0xff]  ;;  %v378_v51 = vld [vmem:[%s1307_s12 + $0xb0] sm:$0xff] }
  0x36   : > { %410 = vmatpush.msra.mxu0 %v397_v6  ;;  %903 = vmatpush.msra.mxu1 %v397_v6  ;;  %v587_v38 = vmul.f32 %v1014_v37, %v585_v32  ;;  %vm592_vm1 = vweird.f32 %v1014_v37  ;;  %v386_v52 = vld [vmem:[%s1307_s12 + $0xf0] sm:$0xff]  ;;  %v379_v55 = vld [vmem:[%s1307_s12 + $0xb8] sm:$0xff]  ;;  %v1354_v60 = vld [vmem:[%s1498_s3] ss:$0 sm:$0xff] }
  0x37   : > { %907 = vmatpush.msra.mxu2 %v396_v7  ;;  %908 = vmatpush.msra.mxu3 %v396_v7  ;;  %vm593_vm2 = vmor %vm591_vm0, %vm592_vm1  ;;  %v362_v53 = vld [vmem:[%s1307_s12 + $0x30] sm:$0xff]  ;;  %v387_v56 = vld [vmem:[%s1307_s12 + $0xf8] sm:$0xff] }
  0x38   : > { %411 = vmatpush.msra.mxu0 %v396_v7  ;;  %906 = vmatpush.msra.mxu1 %v396_v7  ;;  %v588_v40 = vsub.f32 1.0, %v587_v38  ;;  %v370_v54 = vld [vmem:[%s1307_s12 + $0x70] sm:$0xff]  ;;  %v363_v57 = vld [vmem:[%s1307_s12 + $0x38] sm:$0xff] }
  0x39   : > { %910 = vmatpush.msra.mxu2 %v395_v8  ;;  %911 = vmatpush.msra.mxu3 %v395_v8  ;;  %v371_v58 = vld [vmem:[%s1307_s12 + $0x78] sm:$0xff] }
  0x3a   : > { %412 = vmatpush.msra.mxu0 %v395_v8  ;;  %909 = vmatpush.msra.mxu1 %v395_v8  ;;  %v589_v44 = vmul.f32 %v1014_v37, %v588_v40 }
  0x3b   : > { %913 = vmatpush.msra.mxu2 %v394_v9  ;;  %914 = vmatpush.msra.mxu3 %v394_v9 }
  0x3c   : > { %413 = vmatpush.msra.mxu0 %v394_v9  ;;  %912 = vmatpush.msra.mxu1 %v394_v9  ;;  %v590_v48 = vadd.f32 %v1014_v37, %v589_v44 }
  0x3d   : > { %916 = vmatpush.msra.mxu2 %v393_v10  ;;  %917 = vmatpush.msra.mxu3 %v393_v10 }
  0x3e   : > { %414 = vmatpush.msra.mxu0 %v393_v10  ;;  %915 = vmatpush.msra.mxu1 %v393_v10  ;;  %v594_v49 = vsel %vm593_vm2, %v1014_v37, %v590_v48 }
  0x3f   : > { %919 = vmatpush.msra.mxu2 %v392_v11  ;;  %920 = vmatpush.msra.mxu3 %v392_v11  ;;  %v599_v50 = vsel %vm596_vm3, %v598_v47, %v594_v49 }
  0x40   : > { %415 = vmatpush.msra.mxu0 %v392_v11  ;;  %918 = vmatpush.msra.mxu1 %v392_v11  ;;  %933 = vpush %v599_v50 }
  0x41   : > { %922 = vmatpush.msra.mxu2 %v391_v12  ;;  %923 = vmatpush.msra.mxu3 %v391_v12 }
  0x42   : > { %416 = vmatpush.msra.mxu0 %v391_v12  ;;  %921 = vmatpush.msra.mxu1 %v391_v12 }
  0x43   : > { %925 = vmatpush.msra.mxu2 %v390_v13  ;;  %926 = vmatpush.msra.mxu3 %v390_v13 }
  0x44   : > { %417 = vmatpush.msra.mxu0 %v390_v13  ;;  %924 = vmatpush.msra.mxu1 %v390_v13 }
  0x45   : > { %928 = vmatpush.msra.mxu2 %v389_v14  ;;  %929 = vmatpush.msra.mxu3 %v389_v14 }
  0x46   : > { %418 = vmatpush.msra.mxu0 %v389_v14  ;;  %927 = vmatpush.msra.mxu1 %v389_v14 }
  0x47   : > { %931 = vmatpush.msra.mxu2 %v388_v15  ;;  %932 = vmatpush.msra.mxu3 %v388_v15 }
  0x48   : > { %468 = vmatmul.f32.vlgmr.msra.gmra.mxu2 %v372_v16  ;;  %492 = vmatmul.f32.vlgmr.msra.gmra.mxu3 %v380_v17 }
  0x49   : > { %419 = vmatpush.msra.mxu0 %v388_v15  ;;  %930 = vmatpush.msra.mxu1 %v388_v15 }
  0x4a   : > { %420 = vmatmul.f32.vlgmr.msra.gmra.mxu0 %v356_v18  ;;  %444 = vmatmul.f32.vlgmr.msra.gmra.mxu1 %v364_v19 }
  0x50   : > { %471 = vmatmul.f32.gmra.mxu2 %v373_v20  ;;  %495 = vmatmul.f32.gmra.mxu3 %v381_v21 }
  0x52   : > { %423 = vmatmul.f32.gmra.mxu0 %v357_v22  ;;  %447 = vmatmul.f32.gmra.mxu1 %v365_v23 }
  0x58   : > { %474 = vmatmul.f32.gmra.mxu2 %v374_v24  ;;  %498 = vmatmul.f32.gmra.mxu3 %v382_v25 }
  0x5a   : > { %426 = vmatmul.f32.gmra.mxu0 %v358_v26  ;;  %450 = vmatmul.f32.gmra.mxu1 %v366_v27 }
  0x60   : > { %477 = vmatmul.f32.gmra.mxu2 %v375_v28  ;;  %501 = vmatmul.f32.gmra.mxu3 %v383_v29 }
  0x62   : > { %429 = vmatmul.f32.gmra.mxu0 %v359_v30  ;;  %453 = vmatmul.f32.gmra.mxu1 %v367_v31 }
  0x68   : > { %480 = vmatmul.f32.gmra.mxu2 %v376_v33  ;;  %504 = vmatmul.f32.gmra.mxu3 %v384_v34 }
  0x6a   : > { %432 = vmatmul.f32.gmra.mxu0 %v360_v35  ;;  %456 = vmatmul.f32.gmra.mxu1 %v368_v36 }
  0x70   : > { %483 = vmatmul.f32.gmra.mxu2 %v377_v42  ;;  %507 = vmatmul.f32.gmra.mxu3 %v385_v43 }
  0x71   : > { %s934_s24 = spop %933 }
  0x72   : > { %435 = vmatmul.f32.gmra.mxu0 %v361_v45  ;;  %459 = vmatmul.f32.gmra.mxu1 %v369_v46  ;;  %v1349_v59 = vstv %s934_s24 }
  0x78   : > { %486 = vmatmul.f32.gmra.mxu2 %v378_v51  ;;  %510 = vmatmul.f32.gmra.mxu3 %v386_v52 }
  0x7a   : > { %438 = vmatmul.f32.gmra.mxu0 %v362_v53  ;;  %462 = vmatmul.f32.gmra.mxu1 %v370_v54 }
  0x80   : > { %489 = vmatmul.f32.gmra.mxu2 %v379_v55  ;;  %513 = vmatmul.f32.gmra.mxu3 %v387_v56 }
  0x82   : > { %441 = vmatmul.f32.gmra.mxu0 %v363_v57  ;;  %465 = vmatmul.f32.gmra.mxu1 %v371_v58 }
  0xc7   : > { %v421_v61 = vpop.f32.mrf.mxu0  ;;  %v445_v62 = vpop.f32.mrf.mxu1 }
  0xc8   : > { %v634_v63 = vmul.f32 %v1349_v59, %v421_v61  ;;  %v642_v0 = vmul.f32 %v1349_v59, %v445_v62 }
  0xca   : > { %v670_v1 = vadd.f32 %v1354_v60, %v634_v63  ;;  %v678_v2 = vadd.f32 %v1354_v60, %v642_v0 }
  0xcb   : > { %v469_v3 = vpop.f32.mrf.mxu2  ;;  %v493_v4 = vpop.f32.mrf.mxu3 }
  0xcc   : > { %702 = vst [vmem:[%s1362_s8] sm:$0xff] %v670_v1  ;;  %v650_v5 = vmul.f32 %v1349_v59, %v469_v3  ;;  %v658_v6 = vmul.f32 %v1349_v59, %v493_v4 }
  0xcd   : > { %710 = vst [vmem:[%s1362_s8 + $0x40] sm:$0xff] %v678_v2 }
  0xce   : > { %v686_v7 = vadd.f32 %v1354_v60, %v650_v5  ;;  %v694_v8 = vadd.f32 %v1354_v60, %v658_v6 }
  0xcf   : > { %v424_v9 = vpop.f32.mrf.mxu0  ;;  %v448_v10 = vpop.f32.mrf.mxu1 }
  0xd0   : > { %718 = vst [vmem:[%s1362_s8 + $0x80] sm:$0xff] %v686_v7  ;;  %v635_v11 = vmul.f32 %v1349_v59, %v424_v9  ;;  %v643_v12 = vmul.f32 %v1349_v59, %v448_v10 }
  0xd1   : > { %726 = vst [vmem:[%s1362_s8 + $0xc0] sm:$0xff] %v694_v8 }
  0xd2   : > { %v671_v13 = vadd.f32 %v1354_v60, %v635_v11  ;;  %v679_v14 = vadd.f32 %v1354_v60, %v643_v12 }
  0xd3   : > { %v472_v15 = vpop.f32.mrf.mxu2  ;;  %v496_v16 = vpop.f32.mrf.mxu3 }
  0xd4   : > { %703 = vst [vmem:[%s1362_s8 + $0x8] sm:$0xff] %v671_v13  ;;  %v651_v17 = vmul.f32 %v1349_v59, %v472_v15  ;;  %v659_v18 = vmul.f32 %v1349_v59, %v496_v16 }
  0xd5   : > { %711 = vst [vmem:[%s1362_s8 + $0x48] sm:$0xff] %v679_v14 }
  0xd6   : > { %v687_v19 = vadd.f32 %v1354_v60, %v651_v17  ;;  %v695_v20 = vadd.f32 %v1354_v60, %v659_v18 }
  0xd7   : > { %v427_v21 = vpop.f32.mrf.mxu0  ;;  %v451_v22 = vpop.f32.mrf.mxu1 }
  0xd8   : > { %719 = vst [vmem:[%s1362_s8 + $0x88] sm:$0xff] %v687_v19  ;;  %v636_v23 = vmul.f32 %v1349_v59, %v427_v21  ;;  %v644_v24 = vmul.f32 %v1349_v59, %v451_v22 }
  0xd9   : > { %727 = vst [vmem:[%s1362_s8 + $0xc8] sm:$0xff] %v695_v20 }
  0xda   : > { %v672_v25 = vadd.f32 %v1354_v60, %v636_v23  ;;  %v680_v26 = vadd.f32 %v1354_v60, %v644_v24 }
  0xdb   : > { %v475_v27 = vpop.f32.mrf.mxu2  ;;  %v499_v28 = vpop.f32.mrf.mxu3 }
  0xdc   : > { %704 = vst [vmem:[%s1362_s8 + $0x10] sm:$0xff] %v672_v25  ;;  %v652_v29 = vmul.f32 %v1349_v59, %v475_v27  ;;  %v660_v30 = vmul.f32 %v1349_v59, %v499_v28 }
  0xdd   : > { %712 = vst [vmem:[%s1362_s8 + $0x50] sm:$0xff] %v680_v26 }
  0xde   : > { %v688_v31 = vadd.f32 %v1354_v60, %v652_v29  ;;  %v696_v32 = vadd.f32 %v1354_v60, %v660_v30 }
  0xdf   : > { %v430_v33 = vpop.f32.mrf.mxu0  ;;  %v454_v34 = vpop.f32.mrf.mxu1 }
  0xe0   : > { %720 = vst [vmem:[%s1362_s8 + $0x90] sm:$0xff] %v688_v31  ;;  %v637_v35 = vmul.f32 %v1349_v59, %v430_v33  ;;  %v645_v36 = vmul.f32 %v1349_v59, %v454_v34 }
  0xe1   : > { %728 = vst [vmem:[%s1362_s8 + $0xd0] sm:$0xff] %v696_v32 }
  0xe2   : > { %v673_v37 = vadd.f32 %v1354_v60, %v637_v35  ;;  %v681_v38 = vadd.f32 %v1354_v60, %v645_v36 }
  0xe3   : > { %v478_v39 = vpop.f32.mrf.mxu2  ;;  %v502_v40 = vpop.f32.mrf.mxu3 }
  0xe4   : > { %705 = vst [vmem:[%s1362_s8 + $0x18] sm:$0xff] %v673_v37  ;;  %v653_v41 = vmul.f32 %v1349_v59, %v478_v39  ;;  %v661_v42 = vmul.f32 %v1349_v59, %v502_v40 }
  0xe5   : > { %713 = vst [vmem:[%s1362_s8 + $0x58] sm:$0xff] %v681_v38 }
  0xe6   : > { %v689_v43 = vadd.f32 %v1354_v60, %v653_v41  ;;  %v697_v44 = vadd.f32 %v1354_v60, %v661_v42 }
  0xe7   : > { %v433_v45 = vpop.f32.mrf.mxu0  ;;  %v457_v46 = vpop.f32.mrf.mxu1 }
  0xe8   : > { %721 = vst [vmem:[%s1362_s8 + $0x98] sm:$0xff] %v689_v43  ;;  %v638_v47 = vmul.f32 %v1349_v59, %v433_v45  ;;  %v646_v48 = vmul.f32 %v1349_v59, %v457_v46 }
  0xe9   : > { %729 = vst [vmem:[%s1362_s8 + $0xd8] sm:$0xff] %v697_v44 }
  0xea   : > { %v674_v49 = vadd.f32 %v1354_v60, %v638_v47  ;;  %v682_v50 = vadd.f32 %v1354_v60, %v646_v48 }
  0xeb   : > { %v481_v51 = vpop.f32.mrf.mxu2  ;;  %v505_v52 = vpop.f32.mrf.mxu3 }
  0xec   : > { %706 = vst [vmem:[%s1362_s8 + $0x20] sm:$0xff] %v674_v49  ;;  %v654_v53 = vmul.f32 %v1349_v59, %v481_v51  ;;  %v662_v54 = vmul.f32 %v1349_v59, %v505_v52 }
  0xed   : > { %714 = vst [vmem:[%s1362_s8 + $0x60] sm:$0xff] %v682_v50 }
  0xee   : > { %v690_v55 = vadd.f32 %v1354_v60, %v654_v53  ;;  %v698_v56 = vadd.f32 %v1354_v60, %v662_v54 }
  0xef   : > { %v436_v57 = vpop.f32.mrf.mxu0  ;;  %v460_v58 = vpop.f32.mrf.mxu1 }
  0xf0   : > { %722 = vst [vmem:[%s1362_s8 + $0xa0] sm:$0xff] %v690_v55  ;;  %v639_v61 = vmul.f32 %v1349_v59, %v436_v57  ;;  %v647_v62 = vmul.f32 %v1349_v59, %v460_v58 }
  0xf1   : > { %730 = vst [vmem:[%s1362_s8 + $0xe0] sm:$0xff] %v698_v56 }
  0xf2   : > { %v675_v63 = vadd.f32 %v1354_v60, %v639_v61  ;;  %v683_v0 = vadd.f32 %v1354_v60, %v647_v62 }
  0xf3   : > { %v484_v1 = vpop.f32.mrf.mxu2  ;;  %v508_v2 = vpop.f32.mrf.mxu3 }
  0xf4   : > { %707 = vst [vmem:[%s1362_s8 + $0x28] sm:$0xff] %v675_v63  ;;  %v655_v3 = vmul.f32 %v1349_v59, %v484_v1  ;;  %v663_v4 = vmul.f32 %v1349_v59, %v508_v2 }
  0xf5   : > { %715 = vst [vmem:[%s1362_s8 + $0x68] sm:$0xff] %v683_v0 }
  0xf6   : > { %v691_v5 = vadd.f32 %v1354_v60, %v655_v3  ;;  %v699_v6 = vadd.f32 %v1354_v60, %v663_v4 }
  0xf7   : > { %v439_v7 = vpop.f32.mrf.mxu0  ;;  %v463_v8 = vpop.f32.mrf.mxu1 }
  0xf8   : > { %723 = vst [vmem:[%s1362_s8 + $0xa8] sm:$0xff] %v691_v5  ;;  %v640_v9 = vmul.f32 %v1349_v59, %v439_v7  ;;  %v648_v10 = vmul.f32 %v1349_v59, %v463_v8 }
  0xf9   : > { %731 = vst [vmem:[%s1362_s8 + $0xe8] sm:$0xff] %v699_v6 }
  0xfa   : > { %v676_v11 = vadd.f32 %v1354_v60, %v640_v9  ;;  %v684_v12 = vadd.f32 %v1354_v60, %v648_v10 }
  0xfb   : > { %v487_v13 = vpop.f32.mrf.mxu2  ;;  %v511_v14 = vpop.f32.mrf.mxu3 }
  0xfc   : > { %708 = vst [vmem:[%s1362_s8 + $0x30] sm:$0xff] %v676_v11  ;;  %v656_v15 = vmul.f32 %v1349_v59, %v487_v13  ;;  %v664_v16 = vmul.f32 %v1349_v59, %v511_v14 }
  0xfd   : > { %716 = vst [vmem:[%s1362_s8 + $0x70] sm:$0xff] %v684_v12 }
  0xfe   : > { %v692_v17 = vadd.f32 %v1354_v60, %v656_v15  ;;  %v700_v18 = vadd.f32 %v1354_v60, %v664_v16 }
  0xff   : > { %v442_v19 = vpop.f32.mrf.mxu0  ;;  %v466_v20 = vpop.f32.mrf.mxu1 }
 0x100   : > { %724 = vst [vmem:[%s1362_s8 + $0xb0] sm:$0xff] %v692_v17  ;;  %v641_v21 = vmul.f32 %v1349_v59, %v442_v19  ;;  %v649_v22 = vmul.f32 %v1349_v59, %v466_v20 }
 0x101   : > { %732 = vst [vmem:[%s1362_s8 + $0xf0] sm:$0xff] %v700_v18 }
 0x102   : > { %v677_v23 = vadd.f32 %v1354_v60, %v641_v21  ;;  %v685_v24 = vadd.f32 %v1354_v60, %v649_v22 }
 0x103   : > { %v490_v25 = vpop.f32.mrf.mxu2  ;;  %v514_v26 = vpop.f32.mrf.mxu3 }
 0x104   : > { %709 = vst [vmem:[%s1362_s8 + $0x38] sm:$0xff] %v677_v23  ;;  %v657_v27 = vmul.f32 %v1349_v59, %v490_v25  ;;  %v665_v28 = vmul.f32 %v1349_v59, %v514_v26 }
 0x105   : > { %717 = vst [vmem:[%s1362_s8 + $0x78] sm:$0xff] %v685_v24 }
 0x106   : > { %v693_v29 = vadd.f32 %v1354_v60, %v657_v27  ;;  %v701_v30 = vadd.f32 %v1354_v60, %v665_v28 }
 0x108   : > { %725 = vst [vmem:[%s1362_s8 + $0xb8] sm:$0xff] %v693_v29 }
 0x109   : > { %733 = vst [vmem:[%s1362_s8 + $0xf8] sm:$0xff] %v701_v30 }
 0x10a   : > { %1102 = shalt.err (!%p1099_p0)
}
 0x10b   : > { %s1166_s11 = smov 128   ;;  %s1167_s24 = smov 8  }
 0x10c   : > { %941 = dma.vmem_to_hbm [thread:$0]  (%p1278_p5), %s749_s20, 4096, %s751_s29, %s735_s30, %s1166_s11, %s1166_s11, %s1167_s24  }
 0x10d PF: > { %s765_s26 = sand.u32 1, %s1141_s17   ;;  %p952_p3 = pnand %p870_p11, %p1245_p6 }
 0x10e   : > { %s766_s5 = scalar_lea.sflag [#allocation6], %s765_s26 }
 0x10f   : > { %p953_p7 = pneg %p952_p3 }
 0x111   : > { %1136 = dma.done.wait (%p953_p7), %s766_s5, 4096  }
 0x112   : > { %1138 = vsyncadd (%p953_p7), %s766_s5, 4294963200  ;;  %s22_s22 = sadd.s32 1, %s1161_s22   ;;  %s1511_s17 = smov %s1145_s18 }
 0x113   : > { %p19_p9 = scmp.ge.s32.totalorder %s22_s22, 4   ;;  %s1512_s18 = smov %s1149_s19 }
 0x114   : > { %s1513_s19 = smov %s1287_s0  ;;  %s1514_s20 = smov %s1157_s21 }
 0x115   : > { %s1515_s21 = smov %s1517_s10  ;;  %21 = sbr.rel (!%p19_p9) target bundleno = 10 (0xa), region = 97 }
 0x11a   :  { %772 = vsyncpa [#allocation5], 1 }
 0x11b   :  { %774 = vsyncpa [#allocation5 + $0x1], 1 }
 0x11c   :  { %775 = vsyncpa [#allocation8], 1 }
 0x11d   :  { %776 = vsyncpa [#allocation6], 1 }
 0x11e   :  { %778 = vsyncpa [#allocation6 + $0x1], 1 }

</bundles_post_ra>
